<compile_context>
chip_gen: v5e
topology: v5e:2x2
jax: 0.10.0
libtpu: 0.0.40
codegen_flags: <defaults>
</compile_context>

<pallas_src>
import math

import jax
import jax.numpy as jnp
from jax.experimental import pallas as pl
from jax.experimental.pallas import tpu as pltpu

_LANE = 128
_DEFAULT_BLOCK_ROWS = 8192   # 8192 x 128 x f32 = 4 MiB per input per buffer
_MAX_ACC_ROWS = 64           # 8 independent f32 accumulator vregs
_VMEM_BUDGET = 40 << 20      # keep blocks comfortably under v7x's 64 MiB VMEM


def _min_sublanes(dtype):
    # Minimum sublane multiple for a (rows, 128) block of this dtype.
    itemsize = jnp.dtype(dtype).itemsize
    if itemsize >= 4:
        return 8
    if itemsize == 2:
        return 16
    return 32


def _round_up(x, m):
    return ((x + m - 1) // m) * m


def _rmse_partial_kernel(nrows_ref, pred_ref, y_ref, out_ref, acc_ref):
    """Per-core partial sum of squared differences.

    Grid is (ncores, blocks_per_core); axis 0 is 'parallel' (sharded across
    TensorCores on megacore chips), axis 1 is the serial reduction axis.
    """
    core = pl.program_id(0)
    j = pl.program_id(1)
    blocks_per_core = pl.num_programs(1)
    blk_rows = pred_ref.shape[0]
    acc_rows = acc_ref.shape[0]

    # Logical (unclamped) block index; the index_map clamps the DMA source, so
    # fully out-of-range blocks just re-read the last block and are masked out.
    blk_idx = core * blocks_per_core + j
    row_start = blk_idx * blk_rows
    n_rows = nrows_ref[0]

    @pl.when(j == 0)
    def _():
        acc_ref[...] = jnp.zeros_like(acc_ref)

    # Cast on the loaded tile; inputs stay in native dtype in HBM.
    d = pred_ref[...].astype(jnp.float32) - y_ref[...].astype(jnp.float32)
    sq = d * d

    full = row_start + blk_rows <= n_rows

    @pl.when(full)
    def _():
        # Fold into acc_rows independent accumulator rows: pure vreg adds,
        # no cross-lane traffic, 8-way ILP when acc_rows == 64.
        acc_ref[...] += jnp.sum(sq.reshape(-1, acc_rows, _LANE), axis=0)

    @pl.when(jnp.logical_not(full))
    def _():
        # Partial (or fully out-of-range) block: edge-block rows beyond the
        # array hold unspecified data, so masking is mandatory.
        row_ids = row_start + jax.lax.broadcasted_iota(jnp.int32, sq.shape, 0)
        sq_m = jnp.where(row_ids < n_rows, sq, 0.0)
        acc_ref[...] += jnp.sum(sq_m.reshape(-1, acc_rows, _LANE), axis=0)

    @pl.when(j == blocks_per_core - 1)
    def _():
        # Single XLU reduce per core; mean + sqrt finish in the wrapper.
        out_ref[...] = jnp.sum(acc_ref[...], keepdims=True).reshape(1, 1, 1)


def rmse_loss(pred, y, block_rows=_DEFAULT_BLOCK_ROWS):
    assert pred.shape == y.shape, "pred and y must have identical shapes"
    n_elems = int(pred.size)
    if n_elems == 0:
        return jnp.float32(jnp.nan)  # matches torch MSELoss on empty input

    flat_p = pred.reshape(-1)
    flat_y = y.reshape(-1)

    # Lane-align: the common NN case (n % 128 == 0) is a free reshape; the
    # unaligned case pads by < 128 zeros (they contribute 0 to the sum).
    # TODO(synk): a 1-D streaming block layout could remove this O(n) pad copy
    # for unaligned shapes entirely.
    rem = n_elems % _LANE
    if rem:
        flat_p = jnp.pad(flat_p, (0, _LANE - rem))
        flat_y = jnp.pad(flat_y, (0, _LANE - rem))
    rows = flat_p.size // _LANE
    p2 = flat_p.reshape(rows, _LANE)
    y2 = flat_y.reshape(rows, _LANE)

    # Block geometry: biggest lane-dense block that fits the VMEM budget
    # (double-buffered inputs + f32 temporaries), rounded to the dtype's
    # minimum sublane multiple and clamped to the actual row count.
    min_rows = max(_min_sublanes(p2.dtype), _min_sublanes(y2.dtype))
    itembytes = jnp.dtype(p2.dtype).itemsize + jnp.dtype(y2.dtype).itemsize
    bytes_per_row = _LANE * (2 * itembytes + 4 * 4)  # 2x-buffered ins + f32 temps
    budget_rows = max(min_rows,
                      (_VMEM_BUDGET // bytes_per_row) // min_rows * min_rows)
    blk_rows = max(min_rows, min(_round_up(block_rows, min_rows),
                                 _round_up(rows, min_rows),
                                 budget_rows))
    acc_rows = math.gcd(blk_rows, _MAX_ACC_ROWS)

    n_blocks = pl.cdiv(rows, blk_rows)
    # Per-core partial sums: the 2-wide 'parallel' axis shards the reduction
    # across both TensorCores on v7x; on 1-TC chips it is a short serial loop.
    ncores = 2 if n_blocks >= 2 else 1
    blocks_per_core = pl.cdiv(n_blocks, ncores)
    max_blk = n_blocks - 1

    def in_map(c, j, nrows_ref):
        del nrows_ref
        return (jnp.minimum(c * blocks_per_core + j, max_blk), 0)

    vmem_limit = int(min(48 << 20,
                         max(32 << 20, blk_rows * bytes_per_row + (4 << 20))))

    partials = pl.pallas_call(
        _rmse_partial_kernel,
        out_shape=jax.ShapeDtypeStruct((ncores, 1, 1), jnp.float32),
        grid_spec=pltpu.PrefetchScalarGridSpec(
            num_scalar_prefetch=1,
            grid=(ncores, blocks_per_core),
            in_specs=[
                pl.BlockSpec((blk_rows, _LANE), in_map),
                pl.BlockSpec((blk_rows, _LANE), in_map),
            ],
            out_specs=pl.BlockSpec((1, 1, 1), lambda c, j, nrows_ref: (c, 0, 0)),
            scratch_shapes=[pltpu.VMEM((acc_rows, _LANE), jnp.float32)],
        ),
        compiler_params=pltpu.CompilerParams(
            dimension_semantics=("parallel", "arbitrary"),
            vmem_limit_bytes=vmem_limit,
        ),
    )(jnp.array([rows], dtype=jnp.int32), p2, y2)

    total = jnp.sum(partials, dtype=jnp.float32)
    return jnp.sqrt(total / jnp.float32(n_elems))


if __name__ == "__main__":
    key = jax.random.PRNGKey(0)
    k1, k2, k3, k4, k5, k6 = jax.random.split(key, 6)

    # Main test: small NCHW-style maps, f32, lane-aligned (no pad, single block).
    pred = jax.random.normal(k1, (2, 4, 16, 16), dtype=jnp.float32)
    y = jax.random.normal(k2, (2, 4, 16, 16), dtype=jnp.float32)
    loss = rmse_loss(pred, y)
    jax.block_until_ready(loss)
    ref = jnp.sqrt(jnp.mean((pred - y) ** 2))
    assert jnp.allclose(loss, ref, rtol=1e-5, atol=1e-6), (loss, ref)

    # Ragged bf16: unaligned (small pad), multi-block, edge-block masking, and
    # the 2-wide per-core-partials axis with an even block count.
    pred_b = jax.random.normal(k3, (3, 129, 67), dtype=jnp.bfloat16)
    y_b = jax.random.normal(k4, (3, 129, 67), dtype=jnp.bfloat16)
    loss_b = rmse_loss(pred_b, y_b, block_rows=64)
    jax.block_until_ready(loss_b)
    ref_b = jnp.sqrt(
        jnp.mean((pred_b.astype(jnp.float32) - y_b.astype(jnp.float32)) ** 2)
    )
    assert jnp.allclose(loss_b, ref_b, rtol=1e-4, atol=1e-5), (loss_b, ref_b)

    # Odd block count: exercises the clamped (fully-masked) duplicate block on
    # the 2-wide parallel axis plus a partial edge block.
    pred_c = jax.random.normal(k5, (10, 16, 128), dtype=jnp.float32)
    y_c = jax.random.normal(k6, (10, 16, 128), dtype=jnp.float32)
    loss_c = rmse_loss(pred_c, y_c, block_rows=64)
    jax.block_until_ready(loss_c)
    ref_c = jnp.sqrt(jnp.mean((pred_c - y_c) ** 2))
    assert jnp.allclose(loss_c, ref_c, rtol=1e-5, atol=1e-6), (loss_c, ref_c)

    print("KERNEL_OK")
</pallas_src>

<mosaic_0001>
module attributes {stable_mosaic.version = 11 : i64} {
  func.func @_rmse_partial_kernel(%arg0: i32, %arg1: i32, %arg2: memref<1xi32, #tpu.memory_space<smem>>, %arg3: memref<16x128xf32, #tpu.memory_space<vmem>>, %arg4: memref<16x128xf32, #tpu.memory_space<vmem>>, %arg5: memref<1x1x1xf32, #tpu.memory_space<vmem>>, %arg6: memref<16x128xf32, #tpu.memory_space<vmem>>) attributes {dimension_semantics = [#tpu.dimension_semantics<parallel>, #tpu.dimension_semantics<arbitrary>], iteration_bounds = array<i64: 1, 1>, scalar_prefetch = 1 : i64, scratch_operands = 1 : i64, tpu.core_type = #tpu.core_type<tc>, window_params = [{transform_indices = @transform_0, window_bounds = array<i64: 16, 128>}, {transform_indices = @transform_1, window_bounds = array<i64: 16, 128>}, {transform_indices = @transform_2, window_bounds = array<i64: 1, 1, 1>}]} {
    %c1_i32 = arith.constant 1 : i32
    %0 = arith.muli %arg0, %c1_i32 : i32
    %1 = arith.addi %0, %arg1 : i32
    %c16_i32 = arith.constant 16 : i32
    %2 = arith.muli %1, %c16_i32 : i32
    %c0 = arith.constant 0 : index
    %3 = memref.load %arg2[%c0] : memref<1xi32, #tpu.memory_space<smem>>
    %c0_i32 = arith.constant 0 : i32
    %4 = arith.cmpi eq, %arg1, %c0_i32 : i32
    %5 = arith.extui %4 : i1 to i32
    %c0_i32_0 = arith.constant 0 : i32
    %6 = arith.cmpi ne, %5, %c0_i32_0 : i32
    scf.if %6 {
      %cst = arith.constant 0.000000e+00 : f32
      %21 = vector.broadcast %cst : f32 to vector<16x128xf32>
      %c0_10 = arith.constant 0 : index
      %c0_11 = arith.constant 0 : index
      %22 = vector.load %arg6[%c0_10, %c0_11] : memref<16x128xf32, #tpu.memory_space<vmem>>, vector<16x128xf32>
      tpu.vector_store %arg6[%c0_10, %c0_11], %21 {strides = array<i32>} : memref<16x128xf32, #tpu.memory_space<vmem>>, vector<16x128xf32>,
    } else {
    }
    %c0_1 = arith.constant 0 : index
    %c0_2 = arith.constant 0 : index
    %7 = vector.load %arg3[%c0_1, %c0_2] : memref<16x128xf32, #tpu.memory_space<vmem>>, vector<16x128xf32>
    %c0_3 = arith.constant 0 : index
    %c0_4 = arith.constant 0 : index
    %8 = vector.load %arg4[%c0_3, %c0_4] : memref<16x128xf32, #tpu.memory_space<vmem>>, vector<16x128xf32>
    %9 = arith.subf %7, %8 : vector<16x128xf32>
    %10 = arith.mulf %9, %9 : vector<16x128xf32>
    %c16_i32_5 = arith.constant 16 : i32
    %11 = arith.addi %2, %c16_i32_5 : i32
    %12 = arith.cmpi sle, %11, %3 : i32
    %13 = arith.extui %12 : i1 to i32
    %c0_i32_6 = arith.constant 0 : i32
    %14 = arith.cmpi ne, %13, %c0_i32_6 : i32
    scf.if %14 {
      %c0_10 = arith.constant 0 : index
      %c0_11 = arith.constant 0 : index
      %21 = vector.load %arg6[%c0_10, %c0_11] : memref<16x128xf32, #tpu.memory_space<vmem>>, vector<16x128xf32>
      %22 = vector.shape_cast %10 : vector<16x128xf32> to vector<1x16x128xf32>
      %cst = arith.constant dense<0.000000e+00> : vector<16x128xf32>
      %23 = vector.multi_reduction <add>, %22, %cst [0] : vector<1x16x128xf32> to vector<16x128xf32>
      %24 = arith.addf %21, %23 : vector<16x128xf32>
      %c0_12 = arith.constant 0 : index
      %c0_13 = arith.constant 0 : index
      %25 = vector.load %arg6[%c0_12, %c0_13] : memref<16x128xf32, #tpu.memory_space<vmem>>, vector<16x128xf32>
      tpu.vector_store %arg6[%c0_12, %c0_13], %24 {strides = array<i32>} : memref<16x128xf32, #tpu.memory_space<vmem>>, vector<16x128xf32>,
    } else {
    }
    %true = arith.constant true
    %15 = arith.xori %12, %true : i1
    %16 = arith.extui %15 : i1 to i32
    %c0_i32_7 = arith.constant 0 : i32
    %17 = arith.cmpi ne, %16, %c0_i32_7 : i32
    scf.if %17 {
      %21 = tpu.iota {dimensions = array<i32: 0>} : vector<16x128xi32>
      %22 = vector.broadcast %2 : i32 to vector<16x128xi32>
      %23 = arith.addi %22, %21 : vector<16x128xi32>
      %24 = vector.broadcast %3 : i32 to vector<16x128xi32>
      %25 = arith.cmpi slt, %23, %24 : vector<16x128xi32>
      %cst = arith.constant 0.000000e+00 : f32
      %26 = vector.broadcast %cst : f32 to vector<16x128xf32>
      %27 = arith.select %25, %10, %26 : vector<16x128xi1>, vector<16x128xf32>
      %c0_10 = arith.constant 0 : index
      %c0_11 = arith.constant 0 : index
      %28 = vector.load %arg6[%c0_10, %c0_11] : memref<16x128xf32, #tpu.memory_space<vmem>>, vector<16x128xf32>
      %29 = vector.shape_cast %27 : vector<16x128xf32> to vector<1x16x128xf32>
      %cst_12 = arith.constant dense<0.000000e+00> : vector<16x128xf32>
      %30 = vector.multi_reduction <add>, %29, %cst_12 [0] : vector<1x16x128xf32> to vector<16x128xf32>
      %31 = arith.addf %28, %30 : vector<16x128xf32>
      %c0_13 = arith.constant 0 : index
      %c0_14 = arith.constant 0 : index
      %32 = vector.load %arg6[%c0_13, %c0_14] : memref<16x128xf32, #tpu.memory_space<vmem>>, vector<16x128xf32>
      tpu.vector_store %arg6[%c0_13, %c0_14], %31 {strides = array<i32>} : memref<16x128xf32, #tpu.memory_space<vmem>>, vector<16x128xf32>,
    } else {
    }
    %c0_i32_8 = arith.constant 0 : i32
    %18 = arith.cmpi eq, %arg1, %c0_i32_8 : i32
    %19 = arith.extui %18 : i1 to i32
    %c0_i32_9 = arith.constant 0 : i32
    %20 = arith.cmpi ne, %19, %c0_i32_9 : i32
    scf.if %20 {
      %c0_10 = arith.constant 0 : index
      %c0_11 = arith.constant 0 : index
      %21 = vector.load %arg6[%c0_10, %c0_11] : memref<16x128xf32, #tpu.memory_space<vmem>>, vector<16x128xf32>
      %22 = vector.shape_cast %21 : vector<16x128xf32> to vector<1x16x128xf32>
      %cst = arith.constant dense<0.000000e+00> : vector<1xf32>
      %23 = vector.multi_reduction <add>, %22, %cst [1, 2] : vector<1x16x128xf32> to vector<1xf32>
      %24 = vector.shape_cast %23 : vector<1xf32> to vector<1x1x1xf32>
      %25 = vector.extract %24[0, 0, 0] : f32 from vector<1x1x1xf32>
      %26 = vector.broadcast %25 : f32 to vector<1x1xf32>
      %27 = vector.shape_cast %26 : vector<1x1xf32> to vector<1x1x1xf32>
      %c0_12 = arith.constant 0 : index
      %c0_13 = arith.constant 0 : index
      %c0_14 = arith.constant 0 : index
      %28 = vector.load %arg5[%c0_12, %c0_13, %c0_14] : memref<1x1x1xf32, #tpu.memory_space<vmem>>, vector<1x1x1xf32>
      tpu.vector_store %arg5[%c0_12, %c0_13, %c0_14], %27 {strides = array<i32>} : memref<1x1x1xf32, #tpu.memory_space<vmem>>, vector<1x1x1xf32>,
    } else {
    }
    return
  }
  func.func @transform_0(%arg0: i32, %arg1: i32, %arg2: memref<1xi32, #tpu.memory_space<smem>>) -> (i32, i32) {
    %c1_i32 = arith.constant 1 : i32
    %0 = arith.muli %arg0, %c1_i32 : i32
    %1 = arith.addi %0, %arg1 : i32
    %c0_i32 = arith.constant 0 : i32
    %2 = arith.minsi %1, %c0_i32 : i32
    %c0_i32_0 = arith.constant 0 : i32
    %c0_i32_1 = arith.constant 0 : i32
    return %2, %c0_i32_0 : i32, i32
  }
  func.func @transform_1(%arg0: i32, %arg1: i32, %arg2: memref<1xi32, #tpu.memory_space<smem>>) -> (i32, i32) {
    %c1_i32 = arith.constant 1 : i32
    %0 = arith.muli %arg0, %c1_i32 : i32
    %1 = arith.addi %0, %arg1 : i32
    %c0_i32 = arith.constant 0 : i32
    %2 = arith.minsi %1, %c0_i32 : i32
    %c0_i32_0 = arith.constant 0 : i32
    %c0_i32_1 = arith.constant 0 : i32
    return %2, %c0_i32_0 : i32, i32
  }
  func.func @transform_2(%arg0: i32, %arg1: i32, %arg2: memref<1xi32, #tpu.memory_space<smem>>) -> (i32, i32, i32) {
    %c0_i32 = arith.constant 0 : i32
    %c0_i32_0 = arith.constant 0 : i32
    %c0_i32_1 = arith.constant 0 : i32
    return %arg0, %c0_i32, %c0_i32_0 : i32, i32, i32
  }
}

</mosaic_0001>

<bundles_post_ra>
// kernel: tpu_custom_call.1
= control target key start
LH: loop header
LB: loop body
LE: loop exit
PB: predicated region body
PF: predicated region fallthrough
CT: control target
= control target key end

     0   :  { %9 = vsyncpa [#allocation6], 0  ;;  %s293_s0 = inlined_call_operand.<no memory space> [shape: s32[1], index: 0, kind: input, shape index: {}]   ;;  %s294_s1 = inlined_call_operand.hbm [shape: f32[16,128], index: 1, kind: input, shape index: {}]   ;;  %s295_s2 = inlined_call_operand.hbm [shape: f32[16,128], index: 2, kind: input, shape index: {}]   ;;  %s296_s3 = inlined_call_operand.hbm [shape: f32[1,1,1], index: 3, kind: output, shape index: {}]  }
   0x1   :  { %10 = vsyncpa [#allocation9], 0 }
   0x2   :  { %11 = vsyncpa [#allocation7], 0  ;;  %s22_s14 = sshll.u32 %s294_s1, 4  ;;  %s249_s15 = smov [#allocation5]   ;;  %s23_s14 = int_to_ptr.hbm [resolvable:$true] %s22_s14 }
   0x3   :  { %s24_s16 = sshll.u32 %s249_s15, 4  ;;  %s41_s19 = sshll.u32 %s295_s2, 4  ;;  %s25_s16 = int_to_ptr.vmem [resolvable:$true] %s24_s16  ;;  %s42_s19 = int_to_ptr.hbm [resolvable:$true] %s41_s19 }
   0x4   :  { %s250_s20 = smov 128   ;;  %s251_s21 = smov 8  }
   0x5   :  { %30 = dma.hbm_to_vmem [thread:$0]  %s23_s14, 256, %s25_s16, [#allocation6], %s250_s20, %s250_s20, %s251_s21  }
   0x6   :  { %s252_s22 = smov [#allocation8]  }
   0x7   :  { %s43_s23 = sshll.u32 %s252_s22, 4  ;;  %s44_s23 = int_to_ptr.vmem [resolvable:$true] %s43_s23 }
   0x8   :  { %49 = dma.hbm_to_vmem [thread:$0]  %s42_s19, 256, %s44_s23, [#allocation9], %s250_s20, %s250_s20, %s251_s21  }
   0x9   :  { %243 = dma.done.wait [#allocation6], 256  }
   0xa   :  { %244 = vsyncadd [#allocation6], 4294967040 }
   0xb   :  { %245 = dma.done.wait [#allocation9], 256  }
   0xc   :  { %246 = vsyncadd [#allocation9], 4294967040  ;;  %v253_v0 = vmov 0.0   ;;  %v75_v1 = vld [vmem:[#allocation5] sm:$0xff]  ;;  %v76_v2 = vld [vmem:[#allocation5 + $0x8] sm:$0xff]  ;;  %p160_p0 = scmp.lt.s32.totalorder %s293_s0, 16 }
   0xd   :  { %73 = vst [vmem:[#allocation2] sm:$0xff] %v253_v0  ;;  %v77_v3 = vld [vmem:[#allocation8] sm:$0xff]  ;;  %v78_v4 = vld [vmem:[#allocation8 + $0x8] sm:$0xff] }
   0xe   :  { %74 = vst [vmem:[#allocation2 + $0x8] sm:$0xff] %v253_v0  ;;  %v79_v5 = vsub.f32 %v75_v1, %v77_v3  ;;  %v80_v6 = vsub.f32 %v76_v2, %v78_v4  ;;  %87 = sbr.rel (%p160_p0) target bundleno = 25 (0x19), region = 25 }
  0x10   :  { %v81_v7 = vmul.f32 %v79_v5, %v79_v5  ;;  %v82_v8 = vmul.f32 %v80_v6, %v80_v6 }
  0x14   :  { %v88_v9 = vld [vmem:[#allocation2] sm:$0xff] }
  0x15   :  { %v89_v10 = vld [vmem:[#allocation2 + $0x8] sm:$0xff]  ;;  %v92_v11 = vadd.f32 %v88_v9, %v81_v7 }
  0x16   :  { %v93_v12 = vadd.f32 %v89_v10, %v82_v8 }
  0x17   :  { %94 = vst [vmem:[#allocation2] sm:$0xff] %v92_v11 }
  0x18   :  { %95 = vst [vmem:[#allocation2 + $0x8] sm:$0xff] %v93_v12 }
  0x19 PF:  { %p162_p1 = scmp.ge.s32.totalorder %s293_s0, 16 }
  0x1b   :  { %99 = sbr.rel (%p162_p1) target bundleno = 43 (0x2b), region = 29 }
  0x20   :  { %v100_v13 = vlaneseq  ;;  %v106_v14 = vstv %s293_s0  ;;  %v111_v16 = vld [vmem:[#allocation2] sm:$0xff]  ;;  %v112_v19 = vld [vmem:[#allocation2 + $0x8] sm:$0xff] }
  0x22   :  { %v101_v15 = vshrl.u32 %v100_v13, 7 }
  0x24   :  { %vm107_vm0 = vcmp.lt.s32.totalorder %v101_v15, %v106_v14  ;;  %v102_v17 = vadd.s32 8, %v101_v15 }
  0x25   :  { %v109_v18 = vsel %vm107_vm0, %v81_v7, 0.0 }
  0x26   :  { %v115_v20 = vadd.f32 %v111_v16, %v109_v18  ;;  %vm108_vm1 = vcmp.lt.s32.totalorder %v102_v17, %v106_v14 }
  0x27   :  { %v110_v21 = vsel %vm108_vm1, %v82_v8, 0.0 }
  0x28   :  { %117 = vst [vmem:[#allocation2] sm:$0xff] %v115_v20  ;;  %v116_v22 = vadd.f32 %v112_v19, %v110_v21 }
  0x2a   :  { %118 = vst [vmem:[#allocation2 + $0x8] sm:$0xff] %v116_v22 }
  0x2b PF:  { %s254_s0 = smov [#allocation10]   ;;  %s144_s4 = sshll.u32 %s296_s3, 4  ;;  %vm135_vm2 = vcmask 0   ;;  %s145_s4 = int_to_ptr.hbm [resolvable:$true] %s144_s4 }
  0x2c   :  { %s142_s28 = sshll.u32 %s254_s0, 4  ;;  %s143_s28 = int_to_ptr.vmem [resolvable:$true] %s142_s28 }
  0x2f   :  { %v122_v23 = vld [vmem:[#allocation2] sm:$0xff] }
  0x31   :  { %v123_v24 = vld [vmem:[#allocation2 + $0x8] sm:$0xff] }
  0x32   :  { %v124_v25 = vadd.f32 %v123_v24, %v122_v23 }
  0x34   :  { %125 = vadd.xlane.f32.xlu0 %v124_v25 }
  0xa7   :  { %v126_v26 = vpop.xlane.xlu0 %125 }
  0xa8   :  { %v127_v27 = vrot.slane %v126_v26, 4 }
  0xaa   :  { %v128_v28 = vadd.f32 %v127_v27, %v126_v26 }
  0xac   :  { %v129_v29 = vrot.slane %v128_v28, 2 }
  0xae   :  { %v130_v30 = vadd.f32 %v129_v29, %v128_v28 }
  0xb0   :  { %v131_v31 = vrot.slane %v130_v30, 1 }
  0xb2   :  { %v132_v32 = vadd.f32 %v131_v31, %v130_v30 }
  0xb4   :  { %163 = vpush %v132_v32 }
  0xe5   :  { %s164_s5 = spop %163 }
  0xe6   :  { %v134_v33 = vstv %s164_s5 }
  0xe7   :  { %136 = vst.msk [vmem:[#allocation10] sm:$0x1] %vm135_vm2, %v134_v33 }
  0xe8   :  { %147 = dma.vmem_to_hbm [thread:$0]  %s143_s28, 16, %s145_s4, [#allocation7]  }
  0xe9   :  { %247 = dma.done.wait [#allocation7], 16  }
  0xea   :  { %248 = vsyncadd [#allocation7], 4294967280 }
  0xeb   :  { %152 = vsyncpa [#allocation6], 1 }
  0xec   :  { %153 = vsyncpa [#allocation9], 1 }
  0xed   :  { %154 = vsyncpa [#allocation7], 1 }

</bundles_post_ra>
